<compile_context>
chip_gen: v6e
topology: v6e:2x2x1
jax: 0.10.0
libtpu: 0.0.40
codegen_flags: <defaults>
</compile_context>

<pallas_src>
import jax
import jax.numpy as jnp
from jax.experimental import pallas as pl
from jax.experimental.pallas import tpu as pltpu
import numpy as np


def _decoder_kernel(x_ref, h_ref, enc_ref,
                    wih_ref, whh_ref, wc_ref, wo_ref,
                    bg_ref, bo_ref,
                    out_ref, hid_ref):
    f32 = jnp.float32
    cdt = wih_ref.dtype                       # MXU operand dtype (f32 or bf16)

    x = x_ref[...]                            # (1, E)  float32
    h = h_ref[...]                            # (1, H)  float32
    enc = enc_ref[...]                        # (S, H)  compute dtype

    xc = x.astype(cdt)
    hc = h.astype(cdt)

    def mm(a, b):                             # 2-D MXU matmul, f32 accumulation
        return jnp.dot(a, b, preferred_element_type=f32)

    # ---- GRU cell (single layer, single step), PyTorch gate order [r, z, n] --
    i_r = mm(xc, wih_ref[0]); h_r = mm(hc, whh_ref[0])
    i_z = mm(xc, wih_ref[1]); h_z = mm(hc, whh_ref[1])
    i_n = mm(xc, wih_ref[2]); h_n = mm(hc, whh_ref[2])

    b_r = bg_ref[0:1, :]                      # b_ir + b_hr
    b_z = bg_ref[1:2, :]                      # b_iz + b_hz
    b_in = bg_ref[2:3, :]                     # b_in
    b_hn = bg_ref[3:4, :]                     # b_hn (stays inside r * (...))
    b_c = bg_ref[4:5, :]                      # concat-layer bias

    r = jax.nn.sigmoid(i_r + h_r + b_r)
    z = jax.nn.sigmoid(i_z + h_z + b_z)
    n = jnp.tanh(i_n + b_in + r * (h_n + b_hn))
    h_new = (1.0 - z) * n + z * h             # (1, H) float32
    hid_ref[...] = h_new.astype(hid_ref.dtype)

    # ---- dot attention, on the MXU -------------------------------------------
    hnc = h_new.astype(cdt)
    # scores[0, s] = sum_h h_new[0, h] * enc[s, h]   (contract the last dims)
    scores = jax.lax.dot_general(hnc, enc, (((1,), (1,)), ((), ())),
                                 preferred_element_type=f32)          # (1, S)
    scores = scores - jnp.max(scores, axis=1, keepdims=True)
    es = jnp.exp(scores)
    attn = es * pl.reciprocal(jnp.sum(es, axis=1, keepdims=True), approx=True)

    # context[0, h] = sum_s attn[0, s] * enc[s, h]
    context = mm(attn.astype(cdt), enc)                                # (1, H)

    # ---- concat -> Linear(2H, H) -> tanh  (split halves; no lane concat) -----
    cc = jnp.tanh(mm(hnc, wc_ref[0])
                  + mm(context.astype(cdt), wc_ref[1])
                  + b_c)

    # ---- output projection + softmax -----------------------------------------
    logits = mm(cc.astype(cdt), wo_ref[...]) + bo_ref[...]
    logits = logits - jnp.max(logits, axis=1, keepdims=True)
    el = jnp.exp(logits)
    out_ref[...] = (el * pl.reciprocal(jnp.sum(el, axis=1, keepdims=True),
                                       approx=True)).astype(out_ref.dtype)


def attention_decoder_forward(input_step, last_hidden, encoder_output, params,
                              compute_dtype=jnp.bfloat16):
    """input_step: (1, B) int32 token ids
       last_hidden: (1, B, H)         (n_layers = 1)
       encoder_output: (S, B, H)      (PyTorch seq-major convention)"""
    emb = params["embedding"]                 # (V, E)
    B = input_step.shape[1]
    E = emb.shape[1]
    H = last_hidden.shape[2]
    S = encoder_output.shape[0]
    O = params["b_out"].shape[0]

    # Glue done in XLA: embedding gather.
    # TODO(synk): embedding_dropout / GRU dropout are train-mode stochastic ops;
    # implemented as identity (eval semantics).  (nn.GRU dropout is a no-op for
    # n_layers=1 anyway.)
    x3 = jnp.take(emb, input_step[0], axis=0).astype(jnp.float32).reshape(B, 1, E)
    h3 = last_hidden[0].astype(jnp.float32).reshape(B, 1, H)

    # TODO(synk): encoder_output arrives seq-major (S,B,H); a dot_general batched
    # over the *middle* axis is not reliably lowerable by Mosaic, so we make it
    # batch-major once here.  In a real pipeline the encoder should emit
    # batch-major directly so this extra HBM pass disappears.
    enc_bm = jnp.transpose(encoder_output, (1, 0, 2)).astype(compute_dtype)   # (B,S,H)

    # Gate-separated, pre-transposed GRU weights (PyTorch gate order [r,z,n]).
    w_ih, w_hh = params["w_ih"], params["w_hh"]
    wih_g = jnp.stack([w_ih[0:H].T, w_ih[H:2 * H].T, w_ih[2 * H:3 * H].T]
                      ).astype(compute_dtype)                                 # (3,E,H)
    whh_g = jnp.stack([w_hh[0:H].T, w_hh[H:2 * H].T, w_hh[2 * H:3 * H].T]
                      ).astype(compute_dtype)                                 # (3,H,H)
    wc = params["w_concat"]
    wc_g = jnp.stack([wc[:, :H].T, wc[:, H:].T]).astype(compute_dtype)        # (2,H,H)
    wo_t = params["w_out"].T.astype(compute_dtype)                            # (H,O)

    b_ih, b_hh = params["b_ih"], params["b_hh"]
    bg = jnp.stack([b_ih[0:H] + b_hh[0:H],            # r
                    b_ih[H:2 * H] + b_hh[H:2 * H],    # z
                    b_ih[2 * H:3 * H],                # n (input half)
                    b_hh[2 * H:3 * H],                # n (hidden half, gated by r)
                    params["b_concat"]]).astype(jnp.float32)                  # (5,H)
    bo = params["b_out"].reshape(1, O).astype(jnp.float32)                    # (1,O)

    # TODO(synk): for a realistic vocab, tile the output projection over an O
    # grid axis (wo BlockSpec (H, o_tile)) with an accumulated max/sum softmax
    # instead of keeping (H, O) VMEM-resident (v7x has only 64 MiB VMEM).

    out3, hid3 = pl.pallas_call(
        _decoder_kernel,
        grid=(B,),
        in_specs=[
            pl.BlockSpec((None, 1, E), lambda b: (b, 0, 0)),   # x (per example)
            pl.BlockSpec((None, 1, H), lambda b: (b, 0, 0)),   # h0 (per example)
            pl.BlockSpec((None, S, H), lambda b: (b, 0, 0)),   # encoder states
            pl.BlockSpec((3, E, H), lambda b: (0, 0, 0)),      # GRU W_ih (gates)
            pl.BlockSpec((3, H, H), lambda b: (0, 0, 0)),      # GRU W_hh (gates)
            pl.BlockSpec((2, H, H), lambda b: (0, 0, 0)),      # concat W halves
            pl.BlockSpec((H, O), lambda b: (0, 0)),            # out W^T
            pl.BlockSpec((5, H), lambda b: (0, 0)),            # packed biases
            pl.BlockSpec((1, O), lambda b: (0, 0)),            # out bias
        ],
        out_specs=(
            pl.BlockSpec((None, 1, O), lambda b: (b, 0, 0)),
            pl.BlockSpec((None, 1, H), lambda b: (b, 0, 0)),
        ),
        out_shape=(jax.ShapeDtypeStruct((B, 1, O), jnp.float32),
                   jax.ShapeDtypeStruct((B, 1, H), jnp.float32)),
        compiler_params=pltpu.CompilerParams(
            dimension_semantics=("parallel",)),
    )(x3, h3, enc_bm, wih_g, whh_g, wc_g, wo_t, bg, bo)

    out = out3.reshape(B, O)
    hidden = hid3.reshape(1, B, H)
    return out, hidden


def _reference_forward(input_step, last_hidden, encoder_output, params):
    """Pure-JAX f32 reference mirroring the PyTorch forward, for verification."""
    x = jnp.take(params["embedding"], input_step[0], axis=0)
    h = last_hidden[0]
    H = h.shape[1]
    gi = x @ params["w_ih"].T + params["b_ih"]
    gh = h @ params["w_hh"].T + params["b_hh"]
    r = jax.nn.sigmoid(gi[:, :H] + gh[:, :H])
    z = jax.nn.sigmoid(gi[:, H:2 * H] + gh[:, H:2 * H])
    n = jnp.tanh(gi[:, 2 * H:] + r * gh[:, 2 * H:])
    h_new = (1 - z) * n + z * h                                 # (B, H)
    scores = jnp.sum(h_new[None] * encoder_output, axis=2).T    # (B, S)
    attn = jax.nn.softmax(scores, axis=1)
    context = jnp.einsum("bs,sbh->bh", attn, encoder_output)
    cc = jnp.tanh(jnp.concatenate([h_new, context], axis=1) @ params["w_concat"].T
                  + params["b_concat"])
    out = jax.nn.softmax(cc @ params["w_out"].T + params["b_out"], axis=1)
    return out, h_new[None]


if __name__ == "__main__":
    # small shapes consistent with the module
    V, E, H, O = 20, 32, 32, 16      # vocab, input_size(=embed dim), hidden, output
    B, S = 2, 8                      # batch, encoder seq length; n_layers = 1

    key = jax.random.PRNGKey(0)
    ks = jax.random.split(key, 12)
    params = {
        "embedding": jax.random.normal(ks[0], (V, E), jnp.float32) * 0.1,
        "w_ih":      jax.random.normal(ks[1], (3 * H, E), jnp.float32) * 0.1,
        "w_hh":      jax.random.normal(ks[2], (3 * H, H), jnp.float32) * 0.1,
        "b_ih":      jax.random.normal(ks[3], (3 * H,), jnp.float32) * 0.1,
        "b_hh":      jax.random.normal(ks[4], (3 * H,), jnp.float32) * 0.1,
        "w_concat":  jax.random.normal(ks[5], (H, 2 * H), jnp.float32) * 0.1,
        "b_concat":  jax.random.normal(ks[6], (H,), jnp.float32) * 0.1,
        "w_out":     jax.random.normal(ks[7], (O, H), jnp.float32) * 0.1,
        "b_out":     jax.random.normal(ks[8], (O,), jnp.float32) * 0.1,
    }

    input_step = jax.random.randint(ks[9], (1, B), 0, V, dtype=jnp.int32)
    last_hidden = jax.random.normal(ks[10], (1, B, H), jnp.float32)
    encoder_output = jax.random.normal(ks[11], (S, B, H), jnp.float32)

    out_ref, hid_ref = _reference_forward(input_step, last_hidden,
                                          encoder_output, params)

    # f32 MXU operands: tight check (only approx-reciprocal slop expected).
    out32, hid32 = attention_decoder_forward(input_step, last_hidden,
                                             encoder_output, params,
                                             compute_dtype=jnp.float32)
    jax.block_until_ready((out32, hid32))
    np.testing.assert_allclose(np.asarray(out32), np.asarray(out_ref),
                               rtol=5e-3, atol=5e-3)
    np.testing.assert_allclose(np.asarray(hid32), np.asarray(hid_ref),
                               rtol=5e-3, atol=5e-3)

    # bf16 weights / encoder states (perf-recommended config): looser check.
    out16, hid16 = attention_decoder_forward(input_step, last_hidden,
                                             encoder_output, params,
                                             compute_dtype=jnp.bfloat16)
    jax.block_until_ready((out16, hid16))
    np.testing.assert_allclose(np.asarray(out16), np.asarray(out_ref),
                               rtol=1e-1, atol=3e-2)
    np.testing.assert_allclose(np.asarray(hid16), np.asarray(hid_ref),
                               rtol=1e-1, atol=3e-2)

    print("KERNEL_OK")
</pallas_src>

<mosaic_0001>
module attributes {stable_mosaic.version = 11 : i64} {
  func.func @_decoder_kernel(%arg0: i32, %arg1: memref<1x1x32xf32, #tpu.memory_space<vmem>>, %arg2: memref<1x1x32xf32, #tpu.memory_space<vmem>>, %arg3: memref<1x8x32xf32, #tpu.memory_space<vmem>>, %arg4: memref<3x32x32xf32, #tpu.memory_space<vmem>>, %arg5: memref<3x32x32xf32, #tpu.memory_space<vmem>>, %arg6: memref<2x32x32xf32, #tpu.memory_space<vmem>>, %arg7: memref<32x16xf32, #tpu.memory_space<vmem>>, %arg8: memref<5x32xf32, #tpu.memory_space<vmem>>, %arg9: memref<1x16xf32, #tpu.memory_space<vmem>>, %arg10: memref<1x1x16xf32, #tpu.memory_space<vmem>>, %arg11: memref<1x1x32xf32, #tpu.memory_space<vmem>>) attributes {dimension_semantics = [#tpu.dimension_semantics<parallel>], iteration_bounds = array<i64: 2>, scalar_prefetch = 0 : i64, scratch_operands = 0 : i64, tpu.core_type = #tpu.core_type<tc>, window_params = [{transform_indices = @transform_0, window_bounds = array<i64: 1, 1, 32>}, {transform_indices = @transform_1, window_bounds = array<i64: 1, 1, 32>}, {transform_indices = @transform_2, window_bounds = array<i64: 1, 8, 32>}, {pipeline_mode = #tpu.pipeline_mode<synchronous>, transform_indices = @transform_3, window_bounds = array<i64: 3, 32, 32>}, {pipeline_mode = #tpu.pipeline_mode<synchronous>, transform_indices = @transform_4, window_bounds = array<i64: 3, 32, 32>}, {pipeline_mode = #tpu.pipeline_mode<synchronous>, transform_indices = @transform_5, window_bounds = array<i64: 2, 32, 32>}, {pipeline_mode = #tpu.pipeline_mode<synchronous>, transform_indices = @transform_6, window_bounds = array<i64: 32, 16>}, {pipeline_mode = #tpu.pipeline_mode<synchronous>, transform_indices = @transform_7, window_bounds = array<i64: 5, 32>}, {pipeline_mode = #tpu.pipeline_mode<synchronous>, transform_indices = @transform_8, window_bounds = array<i64: 1, 16>}, {transform_indices = @transform_9, window_bounds = array<i64: 1, 1, 16>}, {transform_indices = @transform_10, window_bounds = array<i64: 1, 1, 32>}]} {
    %c0 = arith.constant 0 : index
    %c0_0 = arith.constant 0 : index
    %c0_1 = arith.constant 0 : index
    %0 = vector.load %arg1[%c0, %c0_0, %c0_1] : memref<1x1x32xf32, #tpu.memory_space<vmem>>, vector<1x1x32xf32>
    %1 = vector.shape_cast %0 : vector<1x1x32xf32> to vector<1x32xf32>
    %c0_2 = arith.constant 0 : index
    %c0_3 = arith.constant 0 : index
    %c0_4 = arith.constant 0 : index
    %2 = vector.load %arg2[%c0_2, %c0_3, %c0_4] : memref<1x1x32xf32, #tpu.memory_space<vmem>>, vector<1x1x32xf32>
    %3 = vector.shape_cast %2 : vector<1x1x32xf32> to vector<1x32xf32>
    %c0_5 = arith.constant 0 : index
    %c0_6 = arith.constant 0 : index
    %c0_7 = arith.constant 0 : index
    %4 = vector.load %arg3[%c0_5, %c0_6, %c0_7] : memref<1x8x32xf32, #tpu.memory_space<vmem>>, vector<1x8x32xf32>
    %5 = vector.shape_cast %4 : vector<1x8x32xf32> to vector<8x32xf32>
    %c0_8 = arith.constant 0 : index
    %c0_9 = arith.constant 0 : index
    %c0_10 = arith.constant 0 : index
    %6 = vector.load %arg4[%c0_8, %c0_9, %c0_10] : memref<3x32x32xf32, #tpu.memory_space<vmem>>, vector<1x32x32xf32>
    %7 = vector.shape_cast %6 : vector<1x32x32xf32> to vector<32x32xf32>
    %cst = arith.constant dense<0.000000e+00> : vector<1x32xf32>
    %8 = tpu.matmul %1, %7, %cst {dimension_numbers = #tpu.dot_dimension_numbers<[1], [0], [0], [1], [0, 0, 1, 1], [], []>} : vector<1x32xf32>, vector<32x32xf32>, vector<1x32xf32> -> vector<1x32xf32>
    %c0_11 = arith.constant 0 : index
    %c0_12 = arith.constant 0 : index
    %c0_13 = arith.constant 0 : index
    %9 = vector.load %arg5[%c0_11, %c0_12, %c0_13] : memref<3x32x32xf32, #tpu.memory_space<vmem>>, vector<1x32x32xf32>
    %10 = vector.shape_cast %9 : vector<1x32x32xf32> to vector<32x32xf32>
    %cst_14 = arith.constant dense<0.000000e+00> : vector<1x32xf32>
    %11 = tpu.matmul %3, %10, %cst_14 {dimension_numbers = #tpu.dot_dimension_numbers<[1], [0], [0], [1], [0, 0, 1, 1], [], []>} : vector<1x32xf32>, vector<32x32xf32>, vector<1x32xf32> -> vector<1x32xf32>
    %c1 = arith.constant 1 : index
    %c0_15 = arith.constant 0 : index
    %c0_16 = arith.constant 0 : index
    %12 = vector.load %arg4[%c1, %c0_15, %c0_16] : memref<3x32x32xf32, #tpu.memory_space<vmem>>, vector<1x32x32xf32>
    %13 = vector.shape_cast %12 : vector<1x32x32xf32> to vector<32x32xf32>
    %cst_17 = arith.constant dense<0.000000e+00> : vector<1x32xf32>
    %14 = tpu.matmul %1, %13, %cst_17 {dimension_numbers = #tpu.dot_dimension_numbers<[1], [0], [0], [1], [0, 0, 1, 1], [], []>} : vector<1x32xf32>, vector<32x32xf32>, vector<1x32xf32> -> vector<1x32xf32>
    %c1_18 = arith.constant 1 : index
    %c0_19 = arith.constant 0 : index
    %c0_20 = arith.constant 0 : index
    %15 = vector.load %arg5[%c1_18, %c0_19, %c0_20] : memref<3x32x32xf32, #tpu.memory_space<vmem>>, vector<1x32x32xf32>
    %16 = vector.shape_cast %15 : vector<1x32x32xf32> to vector<32x32xf32>
    %cst_21 = arith.constant dense<0.000000e+00> : vector<1x32xf32>
    %17 = tpu.matmul %3, %16, %cst_21 {dimension_numbers = #tpu.dot_dimension_numbers<[1], [0], [0], [1], [0, 0, 1, 1], [], []>} : vector<1x32xf32>, vector<32x32xf32>, vector<1x32xf32> -> vector<1x32xf32>
    %c2 = arith.constant 2 : index
    %c0_22 = arith.constant 0 : index
    %c0_23 = arith.constant 0 : index
    %18 = vector.load %arg4[%c2, %c0_22, %c0_23] : memref<3x32x32xf32, #tpu.memory_space<vmem>>, vector<1x32x32xf32>
    %19 = vector.shape_cast %18 : vector<1x32x32xf32> to vector<32x32xf32>
    %cst_24 = arith.constant dense<0.000000e+00> : vector<1x32xf32>
    %20 = tpu.matmul %1, %19, %cst_24 {dimension_numbers = #tpu.dot_dimension_numbers<[1], [0], [0], [1], [0, 0, 1, 1], [], []>} : vector<1x32xf32>, vector<32x32xf32>, vector<1x32xf32> -> vector<1x32xf32>
    %c2_25 = arith.constant 2 : index
    %c0_26 = arith.constant 0 : index
    %c0_27 = arith.constant 0 : index
    %21 = vector.load %arg5[%c2_25, %c0_26, %c0_27] : memref<3x32x32xf32, #tpu.memory_space<vmem>>, vector<1x32x32xf32>
    %22 = vector.shape_cast %21 : vector<1x32x32xf32> to vector<32x32xf32>
    %cst_28 = arith.constant dense<0.000000e+00> : vector<1x32xf32>
    %23 = tpu.matmul %3, %22, %cst_28 {dimension_numbers = #tpu.dot_dimension_numbers<[1], [0], [0], [1], [0, 0, 1, 1], [], []>} : vector<1x32xf32>, vector<32x32xf32>, vector<1x32xf32> -> vector<1x32xf32>
    %c0_29 = arith.constant 0 : index
    %c0_30 = arith.constant 0 : index
    %24 = vector.load %arg8[%c0_29, %c0_30] : memref<5x32xf32, #tpu.memory_space<vmem>>, vector<1x32xf32>
    %c1_31 = arith.constant 1 : index
    %c0_32 = arith.constant 0 : index
    %25 = vector.load %arg8[%c1_31, %c0_32] : memref<5x32xf32, #tpu.memory_space<vmem>>, vector<1x32xf32>
    %c2_33 = arith.constant 2 : index
    %c0_34 = arith.constant 0 : index
    %26 = vector.load %arg8[%c2_33, %c0_34] : memref<5x32xf32, #tpu.memory_space<vmem>>, vector<1x32xf32>
    %c3 = arith.constant 3 : index
    %c0_35 = arith.constant 0 : index
    %27 = vector.load %arg8[%c3, %c0_35] : memref<5x32xf32, #tpu.memory_space<vmem>>, vector<1x32xf32>
    %c4 = arith.constant 4 : index
    %c0_36 = arith.constant 0 : index
    %28 = vector.load %arg8[%c4, %c0_36] : memref<5x32xf32, #tpu.memory_space<vmem>>, vector<1x32xf32>
    %29 = arith.addf %8, %11 : vector<1x32xf32>
    %30 = arith.addf %29, %24 : vector<1x32xf32>
    %31 = arith.negf %30 : vector<1x32xf32>
    %32 = math.exp %31 : vector<1x32xf32>
    %cst_37 = arith.constant 1.000000e+00 : f32
    %33 = vector.broadcast %cst_37 : f32 to vector<1x32xf32>
    %34 = arith.addf %33, %32 : vector<1x32xf32>
    %35 = arith.divf %33, %34 : vector<1x32xf32>
    %36 = arith.addf %14, %17 : vector<1x32xf32>
    %37 = arith.addf %36, %25 : vector<1x32xf32>
    %38 = arith.negf %37 : vector<1x32xf32>
    %39 = math.exp %38 : vector<1x32xf32>
    %cst_38 = arith.constant 1.000000e+00 : f32
    %40 = vector.broadcast %cst_38 : f32 to vector<1x32xf32>
    %41 = arith.addf %40, %39 : vector<1x32xf32>
    %42 = arith.divf %40, %41 : vector<1x32xf32>
    %43 = arith.addf %20, %26 : vector<1x32xf32>
    %44 = arith.addf %23, %27 : vector<1x32xf32>
    %45 = arith.mulf %35, %44 : vector<1x32xf32>
    %46 = arith.addf %43, %45 : vector<1x32xf32>
    %47 = math.tanh %46 : vector<1x32xf32>
    %cst_39 = arith.constant 1.000000e+00 : f32
    %48 = vector.broadcast %cst_39 : f32 to vector<1x32xf32>
    %49 = arith.subf %48, %42 : vector<1x32xf32>
    %50 = arith.mulf %49, %47 : vector<1x32xf32>
    %51 = arith.mulf %42, %3 : vector<1x32xf32>
    %52 = arith.addf %50, %51 : vector<1x32xf32>
    %c0_40 = arith.constant 0 : index
    %c0_41 = arith.constant 0 : index
    %c0_42 = arith.constant 0 : index
    %53 = vector.load %arg11[%c0_40, %c0_41, %c0_42] : memref<1x1x32xf32, #tpu.memory_space<vmem>>, vector<1x1x32xf32>
    %54 = vector.shape_cast %53 : vector<1x1x32xf32> to vector<1x32xf32>
    %55 = vector.shape_cast %52 : vector<1x32xf32> to vector<1x1x32xf32>
    tpu.vector_store %arg11[%c0_40, %c0_41, %c0_42], %55 {strides = array<i32>} : memref<1x1x32xf32, #tpu.memory_space<vmem>>, vector<1x1x32xf32>,
    %cst_43 = arith.constant dense<0.000000e+00> : vector<1x8xf32>
    %56 = tpu.matmul %52, %5, %cst_43 {dimension_numbers = #tpu.dot_dimension_numbers<[1], [1], [0], [0], [0, 0, 1, 0], [], []>} : vector<1x32xf32>, vector<8x32xf32>, vector<1x8xf32> -> vector<1x8xf32>
    %cst_44 = arith.constant dense<0xFF800000> : vector<1xf32>
    %57 = vector.multi_reduction <maximumf>, %56, %cst_44 [1] : vector<1x8xf32> to vector<1xf32>
    %58 = vector.shape_cast %57 : vector<1xf32> to vector<1x1xf32>
    %59 = vector.broadcast %58 : vector<1x1xf32> to vector<1x8xf32>
    %60 = arith.subf %56, %59 : vector<1x8xf32>
    %61 = math.exp %60 : vector<1x8xf32>
    %cst_45 = arith.constant dense<0.000000e+00> : vector<1xf32>
    %62 = vector.multi_reduction <add>, %61, %cst_45 [1] : vector<1x8xf32> to vector<1xf32>
    %63 = vector.shape_cast %62 : vector<1xf32> to vector<1x1xf32>
    %64 = tpu.reciprocal %63 {approx = true} : vector<1x1xf32> -> vector<1x1xf32>
    %65 = vector.broadcast %64 : vector<1x1xf32> to vector<1x8xf32>
    %66 = arith.mulf %61, %65 : vector<1x8xf32>
    %cst_46 = arith.constant dense<0.000000e+00> : vector<1x32xf32>
    %67 = tpu.matmul %66, %5, %cst_46 {dimension_numbers = #tpu.dot_dimension_numbers<[1], [0], [0], [1], [0, 0, 1, 1], [], []>} : vector<1x8xf32>, vector<8x32xf32>, vector<1x32xf32> -> vector<1x32xf32>
    %c0_47 = arith.constant 0 : index
    %c0_48 = arith.constant 0 : index
    %c0_49 = arith.constant 0 : index
    %68 = vector.load %arg6[%c0_47, %c0_48, %c0_49] : memref<2x32x32xf32, #tpu.memory_space<vmem>>, vector<1x32x32xf32>
    %69 = vector.shape_cast %68 : vector<1x32x32xf32> to vector<32x32xf32>
    %cst_50 = arith.constant dense<0.000000e+00> : vector<1x32xf32>
    %70 = tpu.matmul %52, %69, %cst_50 {dimension_numbers = #tpu.dot_dimension_numbers<[1], [0], [0], [1], [0, 0, 1, 1], [], []>} : vector<1x32xf32>, vector<32x32xf32>, vector<1x32xf32> -> vector<1x32xf32>
    %c1_51 = arith.constant 1 : index
    %c0_52 = arith.constant 0 : index
    %c0_53 = arith.constant 0 : index
    %71 = vector.load %arg6[%c1_51, %c0_52, %c0_53] : memref<2x32x32xf32, #tpu.memory_space<vmem>>, vector<1x32x32xf32>
    %72 = vector.shape_cast %71 : vector<1x32x32xf32> to vector<32x32xf32>
    %cst_54 = arith.constant dense<0.000000e+00> : vector<1x32xf32>
    %73 = tpu.matmul %67, %72, %cst_54 {dimension_numbers = #tpu.dot_dimension_numbers<[1], [0], [0], [1], [0, 0, 1, 1], [], []>} : vector<1x32xf32>, vector<32x32xf32>, vector<1x32xf32> -> vector<1x32xf32>
    %74 = arith.addf %70, %73 : vector<1x32xf32>
    %75 = arith.addf %74, %28 : vector<1x32xf32>
    %76 = math.tanh %75 : vector<1x32xf32>
    %c0_55 = arith.constant 0 : index
    %c0_56 = arith.constant 0 : index
    %77 = vector.load %arg7[%c0_55, %c0_56] : memref<32x16xf32, #tpu.memory_space<vmem>>, vector<32x16xf32>
    %cst_57 = arith.constant dense<0.000000e+00> : vector<1x16xf32>
    %78 = tpu.matmul %76, %77, %cst_57 {dimension_numbers = #tpu.dot_dimension_numbers<[1], [0], [0], [1], [0, 0, 1, 1], [], []>} : vector<1x32xf32>, vector<32x16xf32>, vector<1x16xf32> -> vector<1x16xf32>
    %c0_58 = arith.constant 0 : index
    %c0_59 = arith.constant 0 : index
    %79 = vector.load %arg9[%c0_58, %c0_59] : memref<1x16xf32, #tpu.memory_space<vmem>>, vector<1x16xf32>
    %80 = arith.addf %78, %79 : vector<1x16xf32>
    %cst_60 = arith.constant dense<0xFF800000> : vector<1xf32>
    %81 = vector.multi_reduction <maximumf>, %80, %cst_60 [1] : vector<1x16xf32> to vector<1xf32>
    %82 = vector.shape_cast %81 : vector<1xf32> to vector<1x1xf32>
    %83 = vector.broadcast %82 : vector<1x1xf32> to vector<1x16xf32>
    %84 = arith.subf %80, %83 : vector<1x16xf32>
    %85 = math.exp %84 : vector<1x16xf32>
    %cst_61 = arith.constant dense<0.000000e+00> : vector<1xf32>
    %86 = vector.multi_reduction <add>, %85, %cst_61 [1] : vector<1x16xf32> to vector<1xf32>
    %87 = vector.shape_cast %86 : vector<1xf32> to vector<1x1xf32>
    %88 = tpu.reciprocal %87 {approx = true} : vector<1x1xf32> -> vector<1x1xf32>
    %89 = vector.broadcast %88 : vector<1x1xf32> to vector<1x16xf32>
    %90 = arith.mulf %85, %89 : vector<1x16xf32>
    %c0_62 = arith.constant 0 : index
    %c0_63 = arith.constant 0 : index
    %c0_64 = arith.constant 0 : index
    %91 = vector.load %arg10[%c0_62, %c0_63, %c0_64] : memref<1x1x16xf32, #tpu.memory_space<vmem>>, vector<1x1x16xf32>
    %92 = vector.shape_cast %91 : vector<1x1x16xf32> to vector<1x16xf32>
    %93 = vector.shape_cast %90 : vector<1x16xf32> to vector<1x1x16xf32>
    tpu.vector_store %arg10[%c0_62, %c0_63, %c0_64], %93 {strides = array<i32>} : memref<1x1x16xf32, #tpu.memory_space<vmem>>, vector<1x1x16xf32>,
    return
  }
  func.func @transform_0(%arg0: i32) -> (i32, i32, i32) {
    %c0_i32 = arith.constant 0 : i32
    %c0_i32_0 = arith.constant 0 : i32
    %c0_i32_1 = arith.constant 0 : i32
    return %arg0, %c0_i32, %c0_i32_0 : i32, i32, i32
  }
  func.func @transform_1(%arg0: i32) -> (i32, i32, i32) {
    %c0_i32 = arith.constant 0 : i32
    %c0_i32_0 = arith.constant 0 : i32
    %c0_i32_1 = arith.constant 0 : i32
    return %arg0, %c0_i32, %c0_i32_0 : i32, i32, i32
  }
  func.func @transform_2(%arg0: i32) -> (i32, i32, i32) {
    %c0_i32 = arith.constant 0 : i32
    %c0_i32_0 = arith.constant 0 : i32
    %c0_i32_1 = arith.constant 0 : i32
    return %arg0, %c0_i32, %c0_i32_0 : i32, i32, i32
  }
  func.func @transform_3(%arg0: i32) -> (i32, i32, i32) {
    %c0_i32 = arith.constant 0 : i32
    %c0_i32_0 = arith.constant 0 : i32
    %c0_i32_1 = arith.constant 0 : i32
    %c0_i32_2 = arith.constant 0 : i32
    return %c0_i32, %c0_i32_0, %c0_i32_1 : i32, i32, i32
  }
  func.func @transform_4(%arg0: i32) -> (i32, i32, i32) {
    %c0_i32 = arith.constant 0 : i32
    %c0_i32_0 = arith.constant 0 : i32
    %c0_i32_1 = arith.constant 0 : i32
    %c0_i32_2 = arith.constant 0 : i32
    return %c0_i32, %c0_i32_0, %c0_i32_1 : i32, i32, i32
  }
  func.func @transform_5(%arg0: i32) -> (i32, i32, i32) {
    %c0_i32 = arith.constant 0 : i32
    %c0_i32_0 = arith.constant 0 : i32
    %c0_i32_1 = arith.constant 0 : i32
    %c0_i32_2 = arith.constant 0 : i32
    return %c0_i32, %c0_i32_0, %c0_i32_1 : i32, i32, i32
  }
  func.func @transform_6(%arg0: i32) -> (i32, i32) {
    %c0_i32 = arith.constant 0 : i32
    %c0_i32_0 = arith.constant 0 : i32
    %c0_i32_1 = arith.constant 0 : i32
    return %c0_i32, %c0_i32_0 : i32, i32
  }
  func.func @transform_7(%arg0: i32) -> (i32, i32) {
    %c0_i32 = arith.constant 0 : i32
    %c0_i32_0 = arith.constant 0 : i32
    %c0_i32_1 = arith.constant 0 : i32
    return %c0_i32, %c0_i32_0 : i32, i32
  }
  func.func @transform_8(%arg0: i32) -> (i32, i32) {
    %c0_i32 = arith.constant 0 : i32
    %c0_i32_0 = arith.constant 0 : i32
    %c0_i32_1 = arith.constant 0 : i32
    return %c0_i32, %c0_i32_0 : i32, i32
  }
  func.func @transform_9(%arg0: i32) -> (i32, i32, i32) {
    %c0_i32 = arith.constant 0 : i32
    %c0_i32_0 = arith.constant 0 : i32
    %c0_i32_1 = arith.constant 0 : i32
    return %arg0, %c0_i32, %c0_i32_0 : i32, i32, i32
  }
  func.func @transform_10(%arg0: i32) -> (i32, i32, i32) {
    %c0_i32 = arith.constant 0 : i32
    %c0_i32_0 = arith.constant 0 : i32
    %c0_i32_1 = arith.constant 0 : i32
    return %arg0, %c0_i32, %c0_i32_0 : i32, i32, i32
  }
}

</mosaic_0001>

<bundles_post_ra>
// kernel: tpu_custom_call.1
= control target key start
LH: loop header
LB: loop body
LE: loop exit
PB: predicated region body
PF: predicated region fallthrough
CT: control target
= control target key end

     0   :  { %s2305_s0 = inlined_call_operand.vmem [shape: f32[2,1,32], index: 0, kind: input, shape index: {}]   ;;  %s2306_s1 = inlined_call_operand.vmem [shape: f32[2,1,32], index: 1, kind: input, shape index: {}]   ;;  %s2307_s2 = inlined_call_operand.vmem [shape: f32[2,8,32], index: 2, kind: input, shape index: {}]   ;;  %s2308_s3 = inlined_call_operand.hbm [shape: f32[3,32,32], index: 3, kind: input, shape index: {}]   ;;  %s2309_s4 = inlined_call_operand.hbm [shape: f32[3,32,32], index: 4, kind: input, shape index: {}]   ;;  %s2310_s5 = inlined_call_operand.hbm [shape: f32[2,32,32], index: 5, kind: input, shape index: {}]   ;;  %s2311_s6 = inlined_call_operand.vmem [shape: f32[32,16], index: 6, kind: input, shape index: {}]   ;;  %s2312_s7 = inlined_call_operand.vmem [shape: f32[5,32], index: 7, kind: input, shape index: {}]   ;;  %s2313_s8 = inlined_call_operand.vmem [shape: f32[1,16], index: 8, kind: input, shape index: {}]   ;;  %s2314_s9 = inlined_call_operand.hbm [shape: f32[2,1,16], index: 9, kind: output, shape index: {0}]   ;;  %s2315_s10 = inlined_call_operand.hbm [shape: f32[2,1,32], index: 10, kind: output, shape index: {1}]  }
   0x1   :  { %2319 = sst [smem:[#allocation16_spill]] %s2305_s0 }
   0x2   :  { %2320 = sst [smem:[#allocation17_spill]] %s2306_s1 }
   0x3   :  { %16 = vsyncpa [#allocation3], 0 }
   0x4   :  { %17 = vsyncpa [#allocation6], 0 }
   0x5   :  { %18 = vsyncpa [#allocation4], 0 }
   0x6   :  { %20 = vsyncpa [#allocation4 + $0x1], 0 }
   0x7   :  { %21 = vsyncpa [#allocation10], 0 }
   0x8   :  { %23 = vsyncpa [#allocation10 + $0x1], 0  ;;  %s2019_s13 = smov 0   ;;  %s2021_s14 = smov 0  }
   0x9   :  { %s2023_s15 = smov 0   ;;  %s2025_s16 = smov 0  }
   0xa LB: > { %s2040_s17 = sadd.s32 4294967295, %s1953_s16   ;;  %s1491_s18 = sadd.s32 4294967294, %s1953_s16   ;;  %s1953_s16 = sphi %s2025_s16, %s2339_s16   ;;  %s1949_s15 = sphi %s2023_s15, %s2338_s15   ;;  %s1945_s14 = sphi %s2021_s14, %s2337_s14   ;;  %s1941_s13 = sphi %s2019_s13, %s2336_s13  }
   0xb   : > { %s2044_s19 = sadd.s32 1, %s1953_s16   ;;  %s240_s20 = sadd.s32 1, %s1949_s15 }
   0xc   : > { %s237_s21 = ssub.s32 %s1953_s16, %s2044_s19  ;;  %p250_p0 = scmp.ne.s32.totalorder %s1949_s15, %s1945_s14 }
   0xd   : > { %p238_p1 = scmp.eq.s32.totalorder %s237_s21, 0  ;;  %p251_p2 = scmp.eq.s32.totalorder %s2040_s17, 1 }
   0xe   : > { %p256_p3 = scmp.ne.s32.totalorder %s1945_s14, %s1941_s13  ;;  %p257_p4 = scmp.eq.s32.totalorder %s1491_s18, 1 }
   0xf   : > { %s2055_s22 = scalar_select %p238_p1, %s1949_s15, %s240_s20  }
  0x10   : > { %p2057_p5 = por %p251_p2, %p250_p0  ;;  %p2061_p6 = por %p257_p4, %p256_p3 }
  0x11   : > { %2321 = sst [smem:[#allocation15_spill]] %s2055_s22  ;;  %p1492_p7 = scmp.ge.s32.totalorder %s1953_s16, 1 }
  0x12   : > { %s2322_s23 = scalar_select %p2057_p5, 1, 0 }
  0x13   : > { %s2323_s24 = scalar_select %p2061_p6, 1, 0 }
  0x14   : > { %p290_p8 = scmp.lt.s32.totalorder %s1953_s16, 3  ;;  %p2316_p9 = scmp.eq.s32.totalorder %s2040_s17, 0 }
  0x15   : > { %s1955_s26 = smov [#allocation5]   ;;  %s1956_s29 = smov [#allocation2]  }
  0x16   : > { %p2068_p10 = pnand %p1492_p7, %p290_p8  ;;  %s315_s27 = sshll.u32 %s1955_s26, 4  ;;  %s316_s27 = int_to_ptr.vmem [resolvable:$true] %s315_s27 }
  0x17   : > { %s302_s30 = sshll.u32 %s1956_s29, 4  ;;  %s1957_s11 = smov [#allocation7]   ;;  %s303_s30 = int_to_ptr.vmem [resolvable:$true] %s302_s30 }
  0x18   : > { %p1694_p11 = pneg %p2068_p10  ;;  %s328_s12 = sshll.u32 %s1957_s11, 4  ;;  %s329_s12 = int_to_ptr.vmem [resolvable:$true] %s328_s12 }
  0x19   : > { %s1788_s18 = scalar_lea.vmem %s316_s27, 1536  ;;  %p1796_p3 = scmp.lt.s32.totalorder %s316_s27, %s316_s27 }
  0x1a   : > { %p2076_p12 = pnand %p2316_p9, %p1694_p11  ;;  %p1789_p0 = scmp.ne.s32.totalorder %s316_s27, %s1788_s18 }
  0x1b   : > { %p1797_p4 = scmp.lt.s32.totalorder %s1788_s18, %s1788_s18 }
  0x1c   : > { %p1779_p13 = pneg %p2076_p12 }
  0x1d   : > { %p1798_p7 = por %p1797_p4, %p1796_p3 }
  0x1e   : > { %p1791_p1 = pnand %p1789_p0, %p1779_p13 }
  0x20   : > { %p1792_p2 = pneg %p1791_p1 }
  0x22   : > { %p1799_p8 = pnand %p1798_p7, %p1792_p2 }
  0x24   : > { %1802 = shalt.err (!%p1799_p8)
}
  0x25   : > { %s1958_s20 = smov 128   ;;  %s1959_s21 = smov 8  }
  0x26   : > { %1700 = dma.hbm_to_vmem [thread:$0]  (!%p2076_p12), %s2309_s4, 1536, %s316_s27, [#allocation6], %s1958_s20, %s1958_s20, %s1959_s21  }
  0x27   : > { %s1814_s11 = scalar_lea.vmem %s303_s30, 1536  ;;  %p1822_p9 = scmp.lt.s32.totalorder %s303_s30, %s303_s30 }
  0x28   : > { %p1815_p11 = scmp.ne.s32.totalorder %s303_s30, %s1814_s11  ;;  %p1823_p6 = scmp.lt.s32.totalorder %s1814_s11, %s1814_s11 }
  0x2a   : > { %p1817_p0 = pnand %p1815_p11, %p1779_p13  ;;  %p1824_p3 = por %p1823_p6, %p1822_p9 }
  0x2c   : > { %p1818_p1 = pneg %p1817_p0 }
  0x2e   : > { %p1825_p2 = pnand %p1824_p3, %p1818_p1 }
  0x30   : > { %1828 = shalt.err (!%p1825_p2)
}
  0x31   : > { %1697 = dma.hbm_to_vmem [thread:$0]  (!%p2076_p12), %s2308_s3, 1536, %s303_s30, [#allocation3], %s1958_s20, %s1958_s20, %s1959_s21  }
  0x32   : > { %s1840_s27 = scalar_lea.vmem %s329_s12, 1024  ;;  %p1848_p11 = scmp.lt.s32.totalorder %s329_s12, %s329_s12 }
  0x33   : > { %p1841_p4 = scmp.ne.s32.totalorder %s329_s12, %s1840_s27  ;;  %p1849_p0 = scmp.lt.s32.totalorder %s1840_s27, %s1840_s27 }
  0x35   : > { %p1843_p7 = pnand %p1841_p4, %p1779_p13  ;;  %p1850_p5 = por %p1849_p0, %p1848_p11 }
  0x37   : > { %p1844_p8 = pneg %p1843_p7 }
  0x39   : > { %p1851_p6 = pnand %p1850_p5, %p1844_p8 }
  0x3b   : > { %1854 = shalt.err (!%p1851_p6)
}
  0x3c   : > { %1703 = dma.hbm_to_vmem [thread:$0]  (!%p2076_p12), %s2310_s5, 1024, %s329_s12, [#allocation6], %s1958_s20, %s1958_s20, %s1959_s21  }
  0x3d   : > { %372 = sbr.rel (%p2068_p10) target bundleno = 1768 (0x6e8), region = 56  ;;  %p2326_p9 = scmp.eq.s32.totalorder (!%p2068_p10), %s2040_s17, 0 }
  0x42   : > { %1924 = dma.done.wait (%p2326_p9), [#allocation3], 1536   ;;  %p2327_p13 = pmov %p2326_p9 }
  0x43   : > { %p2328_p1 = pmov %p2326_p9 }
  0x44   : > { %1926 = vsyncadd (%p2327_p13), [#allocation3], 4294965760 }
  0x45   : > { %1928 = dma.done.wait (%p2328_p1), [#allocation6], 2560   ;;  %p2329_p5 = pmov %p2328_p1 }
  0x46   : > { %v1960_v0 = vmov 0.0   ;;  %vm1961_vm0 = vmmov 0   ;;  %p426_p10 = scmp.lt.s32.totalorder %s2040_s17, 1  ;;  %v446_v1 = vld [vmem:[#allocation5 + $0x18] sm:$0xff]  ;;  %v445_v2 = vld [vmem:[#allocation5 + $0x10] sm:$0xff]  ;;  %v444_v3 = vld [vmem:[#allocation5 + $0x8] sm:$0xff] }
  0x47   : > { %1930 = vsyncadd (%p2329_p5), [#allocation6], 4294964736  ;;  %1569 = vmatprep.subr.mxu0 %v1960_v0  ;;  %1577 = vmatprep.mubr.msk.f32.mxu0 %vm1961_vm0, %v1960_v0  ;;  %s2330_s1 = sld [smem:[#allocation17_spill]]  ;;  %v530_v4 = vld [vmem:[#allocation5 + $0x38] sm:$0xff]  ;;  %v529_v5 = vld [vmem:[#allocation5 + $0x30] sm:$0xff]  ;;  %vm447_vm1 = vcmask 261120  }
  0x48   : > { %1580 = vmatprep.subr.mxu1 %v1960_v0  ;;  %1588 = vmatprep.mubr.msk.f32.mxu1 %vm1961_vm0, %v1960_v0  ;;  %s2124_s22 = scalar_select %p426_p10, %s2040_s17, 1  ;;  %v443_v6 = vld [vmem:[#allocation5] sm:$0xff]  ;;  %v528_v7 = vld [vmem:[#allocation5 + $0x28] sm:$0xff]  ;;  %v442_v9 = vld [vmem:[#allocation2 + $0x18] sm:$0xff]  ;;  %vm920_vm2 = vcmask 253952   ;;  %vm998_vm3 = vcmask 57344  }
  0x49   : > { %1570 = vmatpush3.msra.mxu0 %v446_v1  ;;  %1581 = vmatpush3.msra.mxu1 %v530_v4  ;;  %v441_v10 = vld [vmem:[#allocation2 + $0x10] sm:$0xff]  ;;  %v527_v11 = vld [vmem:[#allocation5 + $0x20] sm:$0xff]  ;;  %v440_v12 = vld [vmem:[#allocation2 + $0x8] sm:$0xff]  ;;  %s2331_s0 = sld [smem:[#allocation16_spill]]  ;;  %vm1010_vm4 = vcmask 64512   ;;  %vm1316_vm5 = vcmask 122880  }
  0x4a   : > { %1571 = vmatprep.subr.mxu0 %v1960_v0  ;;  %1582 = vmatprep.subr.mxu1 %v1960_v0  ;;  %v525_v13 = vld [vmem:[#allocation2 + $0x38] sm:$0xff]  ;;  %v439_v14 = vld [vmem:[#allocation2] sm:$0xff]  ;;  %v524_v16 = vld [vmem:[#allocation2 + $0x30] sm:$0xff]  ;;  %s1501_s11 = sshll.u32 %s2124_s22, 3  ;;  %s2318_s29 = sshll.u32 %s2040_s17, 4 }
  0x4b   : > { %1572 = vmatpush3.msra.mxu0 %v445_v2  ;;  %1583 = vmatpush3.msra.mxu1 %v529_v5  ;;  %v523_v17 = vld [vmem:[#allocation2 + $0x28] sm:$0xff]  ;;  %v605_v18 = vld [vmem:[#allocation2 + $0x58] sm:$0xff]  ;;  %v522_v19 = vld [vmem:[#allocation2 + $0x20] sm:$0xff]  ;;  %s435_s26 = scalar_lea.vmem %s2307_s2, %s1501_s11  ;;  %s2200_s11 = sand.u32 1, %s1945_s14  }
  0x4c   : > { %1573 = vmatprep.subr.mxu0 %v1960_v0  ;;  %1584 = vmatprep.subr.mxu1 %v1960_v0  ;;  %v610_v20 = vld [vmem:[#allocation5 + $0x58] sm:$0xff]  ;;  %v604_v21 = vld [vmem:[#allocation2 + $0x50] sm:$0xff]  ;;  %v603_v23 = vld [vmem:[#allocation2 + $0x48] sm:$0xff]  ;;  %s425_s18 = scalar_lea.vmem [#allocation9], %s2200_s11  ;;  %s1357_s28 = scalar_lea.hbm %s2315_s10, %s2318_s29 }
  0x4d   : > { %s431_s30 = scalar_lea.vmem %s2330_s1, %s2124_s22  ;;  %1574 = vmatpush3.msra.mxu0 %v444_v3  ;;  %1585 = vmatpush3.msra.mxu1 %v528_v7  ;;  %v609_v22 = vld [vmem:[#allocation5 + $0x50] sm:$0xff]  ;;  %v608_v24 = vld [vmem:[#allocation5 + $0x48] sm:$0xff]  ;;  %v602_v25 = vld [vmem:[#allocation2 + $0x40] sm:$0xff]  ;;  %s1334_s12 = scalar_lea.sflag [#allocation10], %s2200_s11 }
  0x4e   : > { %v2133_v8 = vld [vmem:[%s431_s30] sm:$0x1]  ;;  %1575 = vmatprep.subr.mxu0 %v1960_v0  ;;  %1586 = vmatprep.subr.mxu1 %v1960_v0  ;;  %v612_v39 = vld [vmem:[%s2312_s7 + $0x1] sm:$0x1]  ;;  %v614_v51 = vld [vmem:[%s2312_s7 + $0x3] sm:$0x1] }
  0x4f   : > { %1576 = vmatpush3.msra.mxu0 %v443_v6  ;;  %s428_s21 = scalar_lea.vmem %s2331_s0, %s2124_s22  ;;  %1587 = vmatpush3.msra.mxu1 %v527_v11  ;;  %v607_v26 = vld [vmem:[#allocation5 + $0x40] sm:$0xff]  ;;  %v1091_v11 = vld [vmem:[#allocation7 + $0x30] sm:$0xff]  ;;  %s1359_s30 = sshll.u32 %s425_s18, 4  ;;  %s1360_s30 = int_to_ptr.vmem [resolvable:$true] %s1359_s30 }
  0x50   : > { %1578 = vmatmul.mubr.msk.f32.vlgmr.msra.gmra.mxu0 %vm447_vm1, %v2133_v8  ;;  %1591 = vmatprep.subr.mxu0 %v1960_v0  ;;  %v436_v15 = vld [vmem:[%s428_s21] sm:$0x1]  ;;  %v613_v52 = vld [vmem:[%s2312_s7 + $0x2] sm:$0x1]  ;;  %s1855_s20 = scalar_lea.vmem %s1360_s30, 16  ;;  %p2332_p3 = scmp.ne.s32.totalorder %s2322_s23, 0 }
  0x51   : > { %1592 = vmatpush3.msra.mxu0 %v442_v9  ;;  %1599 = vmatprep.mubr.msk.f32.mxu0 %vm1961_vm0, %v1960_v0  ;;  %v438_v27 = vld [vmem:[%s435_s26] sm:$0xff]  ;;  %p1856_p12 = scmp.ne.s32.totalorder %s1360_s30, %s1855_s20  ;;  %s1962_s21 = smov [#allocation9]  }
  0x52   : > { %1593 = vmatprep.subr.mxu0 %v1960_v0  ;;  %1602 = vmatprep.subr.mxu1 %v1960_v0  ;;  %v611_v32 = vld [vmem:[%s2312_s7] sm:$0x1]  ;;  %s1859_s27 = sshll.u32 %s1962_s21, 4  ;;  %s1860_s27 = int_to_ptr.vmem [resolvable:$false] %s1859_s27 }
  0x53   : > { %1594 = vmatpush3.msra.mxu0 %v441_v10  ;;  %1589 = vmatmul.mubr.msk.f32.vlgmr.msra.gmra.mxu1 %vm447_vm1, %v2133_v8  ;;  %v1092_v10 = vld [vmem:[#allocation7 + $0x38] sm:$0xff]  ;;  %p1857_p2 = pnand %p1856_p12, %p2332_p3  ;;  %s1861_s26 = scalar_lea.vmem %s1860_s27, 32 }
  0x54   : > { %1595 = vmatprep.subr.mxu0 %v1960_v0  ;;  %1603 = vmatpush3.msra.mxu1 %v525_v13  ;;  %p1862_p7 = scmp.lt.s32.totalorder %s1360_s30, %s1860_s27  ;;  %p1863_p8 = scmp.lt.s32.totalorder %s1861_s26, %s1855_s20 }
  0x55   : > { %1596 = vmatpush3.msra.mxu0 %v440_v12  ;;  %1604 = vmatprep.subr.mxu1 %v1960_v0  ;;  %v1090_v12 = vld [vmem:[#allocation7 + $0x28] sm:$0xff]  ;;  %p1858_p4 = pneg %p1857_p2 }
  0x56   : > { %1597 = vmatprep.subr.mxu0 %v1960_v0  ;;  %1605 = vmatpush3.msra.mxu1 %v524_v16  ;;  %v1087_v16 = vld [vmem:[#allocation7 + $0x18] sm:$0xff]  ;;  %p1864_p11 = por %p1863_p8, %p1862_p7 }
  0x57   : > { %1598 = vmatpush3.msra.mxu0 %v439_v14  ;;  %1606 = vmatprep.subr.mxu1 %v1960_v0 }
  0x58   : > { %1600 = vmatmul.mubr.msk.f32.vlgmr.msra.gmra.mxu0 %vm447_vm1, %v436_v15  ;;  %1610 = vmatprep.mubr.msk.f32.mxu1 %vm1961_vm0, %v1960_v0  ;;  %p1865_p0 = pnand %p1864_p11, %p1858_p4 }
  0x59   : > { %1607 = vmatpush3.msra.mxu1 %v523_v17  ;;  %1613 = vmatprep.subr.mxu0 %v1960_v0  ;;  %v1086_v17 = vld [vmem:[#allocation7 + $0x10] sm:$0xff] }
  0x5a   : > { %1608 = vmatprep.subr.mxu1 %v1960_v0  ;;  %1614 = vmatpush3.msra.mxu0 %v605_v18  ;;  %v1085_v18 = vld [vmem:[#allocation7 + $0x8] sm:$0xff] }
  0x5b   : > { %1609 = vmatpush3.msra.mxu1 %v522_v19  ;;  %1615 = vmatprep.subr.mxu0 %v1960_v0  ;;  %v1084_v19 = vld [vmem:[#allocation7] sm:$0xff] }
  0x5c   : > { %1611 = vmatmul.mubr.msk.f32.vlgmr.msra.gmra.mxu1 %vm447_vm1, %v436_v15  ;;  %1624 = vmatprep.subr.mxu1 %v1960_v0 }
  0x5d   : > { %1625 = vmatpush3.msra.mxu1 %v610_v20  ;;  %1616 = vmatpush3.msra.mxu0 %v604_v21  ;;  %v1089_v20 = vld [vmem:[#allocation7 + $0x20] sm:$0xff] }
  0x5e   : > { %1626 = vmatprep.subr.mxu1 %v1960_v0  ;;  %1617 = vmatprep.subr.mxu0 %v1960_v0 }
  0x5f   : > { %1627 = vmatpush3.msra.mxu1 %v609_v22  ;;  %1618 = vmatpush3.msra.mxu0 %v603_v23 }
  0x60   : > { %1628 = vmatprep.subr.mxu1 %v1960_v0  ;;  %1632 = vmatprep.mubr.msk.f32.mxu1 %vm1961_vm0, %v1960_v0 }
  0x61   : > { %1629 = vmatpush3.msra.mxu1 %v608_v24  ;;  %1619 = vmatprep.subr.mxu0 %v1960_v0 }
  0x62   : > { %1630 = vmatprep.subr.mxu1 %v1960_v0  ;;  %1620 = vmatpush3.msra.mxu0 %v602_v25  ;;  %v1241_v25 = vld [vmem:[%s2311_s6 + $0x18] sm:$0xff] }
  0x63   : > { %1631 = vmatpush3.msra.mxu1 %v607_v26  ;;  %1621 = vmatprep.mubr.msk.f32.mxu0 %vm1961_vm0, %v1960_v0  ;;  %v1240_v26 = vld [vmem:[%s2311_s6 + $0x10] sm:$0xff] }
  0x64   : > { %1633 = vmatmul.mubr.msk.f32.vlgmr.msra.gmra.mxu1 %vm447_vm1, %v2133_v8  ;;  %1622 = vmatmul.mubr.msk.f32.vlgmr.msra.gmra.mxu0 %vm447_vm1, %v436_v15 }
  0x65   : > { %1635 = vmatprep.subr.mxu1 %v1960_v0  ;;  %1637 = vmatprep.mubr.msk.f32.mxu1 %vm1961_vm0, %v1960_v0 }
  0x66   : > { %1645 = vmatprep.subr.mxu0 %v1960_v0  ;;  %1653 = vmatprep.mubr.msk.f32.mxu0 %vm1961_vm0, %v1960_v0 }
  0x67   : > { %1636 = vmatpush3.xpose.msk.msra.mxu1 %vm447_vm1, %v438_v27  ;;  %1646 = vmatpush3.msra.mxu0 %v1092_v10 }
  0x68   : > { %1640 = vmatprep.subr.mxu1 %v1960_v0  ;;  %1647 = vmatprep.subr.mxu0 %v1960_v0 }
  0x69   : > { %1648 = vmatpush3.msra.mxu0 %v1091_v11 }
  0x6a   : > { %1649 = vmatprep.subr.mxu0 %v1960_v0 }
  0x6b   : > { %1650 = vmatpush3.msra.mxu0 %v1090_v12 }
  0x6c   : > { %1651 = vmatprep.subr.mxu0 %v1960_v0 }
  0x6d   : > { %1652 = vmatpush3.msra.mxu0 %v1089_v20 }
  0x6e   : > { %1667 = vmatprep.subr.mxu0 %v1960_v0 }
 0x110   : > { %v517_v28 = vpop.f32.mrf.mxu0 }
 0x112   : > { %v1579_v29 = vpop.f32.mrf.mxu0 }
 0x113   : > { %v597_v30 = vpop.f32.mrf.mxu1  ;;  %v615_v29 = vld [vmem:[%s2312_s7 + $0x4] sm:$0x1] }
 0x115   : > { %v1590_v31 = vpop.f32.mrf.mxu1 }
 0x118   : > { %v685_v33 = vpop.f32.mrf.mxu0 }
 0x119   : > { %v686_v34 = vadd.f32 %v685_v33, %v517_v28  ;;  %v1238_v28 = vld [vmem:[%s2311_s6] sm:$0xff] }
 0x11a   : > { %v1601_v35 = vpop.f32.mrf.mxu0 }
 0x11b   : > { %v689_v36 = vadd.f32 %v686_v34, %v611_v32  ;;  %v1242_v35 = vld [vmem:[%s2313_s8] sm:$0x1] }
 0x11c   : > { %v762_v38 = vpop.f32.mrf.mxu1 }
 0x11d   : > { %v1505_v37 = vmul.f32 -1.442695, %v689_v36  ;;  %v763_v40 = vadd.f32 %v762_v38, %v597_v30 }
 0x11e   : > { %v1612_v41 = vpop.f32.mrf.mxu1 }
 0x11f   : > { %1757 = vpow2.f32 %v1505_v37  ;;  %v766_v42 = vadd.f32 %v763_v40, %v612_v39 }
 0x121   : > { %v1507_v43 = vmul.f32 -1.442695, %v766_v42 }
 0x123   : > { %1759 = vpow2.f32 %v1507_v43 }
 0x124   : > { %v909_v44 = vpop.f32.mrf.mxu1  ;;  %v839_v45 = vpop.f32.mrf.mxu0 }
 0x125   : > { %v910_v54 = vadd.f32 %v909_v44, %v614_v51  ;;  %v840_v55 = vadd.f32 %v839_v45, %v613_v52 }
 0x126   : > { %v1634_v46 = vpop.f32.mrf.mxu1  ;;  %v1623_v47 = vpop.f32.mrf.mxu0 }
 0x12c   : > { %v1758_v48 = vpop.eup %1757 }
 0x12d   : > { %v693_v49 = vadd.f32 1.0, %v1758_v48 }
 0x12f   : > { %1761 = vrcp.f32 %v693_v49 }
 0x130   : > { %v1760_v50 = vpop.eup %1759 }
 0x131   : > { %v770_v53 = vadd.f32 1.0, %v1760_v50 }
 0x133   : > { %1763 = vrcp.f32 %v770_v53 }
 0x13c   : > { %v1762_v56 = vpop.eup %1761 }
 0x13d   : > { %v913_v57 = vmul.f32 %v1762_v56, %v910_v54 }
 0x13f   : > { %v914_v58 = vadd.f32 %v913_v57, %v840_v55 }
 0x140   : > { %v1764_v59 = vpop.eup %1763 }
 0x141   : > { %1765 = vtanh.f32 %v914_v58  ;;  %v916_v60 = vsub.f32 1.0, %v1764_v59  ;;  %v918_v63 = vmul.f32 %v1764_v59, %v2133_v8 }
 0x14e   : > { %v1766_v61 = vpop.eup %1765 }
 0x14f   : > { %v917_v62 = vmul.f32 %v1766_v61, %v916_v60 }
 0x151   : > { %v919_v1 = vadd.f32 %v918_v63, %v917_v62 }
 0x153   : > { %1638 = vmatmul.mubr.msk.f32.vlgmr.msra.gmra.mxu1 %vm447_vm1, %v919_v1  ;;  %921 = vst.msk [vmem:[%s425_s18] sm:$0x1] %vm920_vm2, %v919_v1 }
 0x154   : > { %1641 = vmatpush3.msra.mxu1 %v438_v27  ;;  %1642 = vmatprep.mubr.msk.f32.mxu1 %vm1961_vm0, %v1960_v0  ;;  %v1239_v27 = vld [vmem:[%s2311_s6 + $0x8] sm:$0xff] }
 0x155   : > { %1656 = vmatprep.subr.mxu1 %v1960_v0 }
 0x213   : > { %v994_v2 = vpop.f32.mrf.mxu1 }
 0x214   : > { %v999_v3 = vsel %vm998_vm3, %v994_v2, -inf }
 0x215   : > { %1000 = vmax.xlane.f32.xlu0 %v999_v3  ;;  %v1639_v4 = vpop.f32.mrf.mxu1 }
 0x29e   : > { %v1001_v5 = vpop.xlane.xlu0 %1000 }
 0x29f   : > { %v1002_v6 = vsub.f32 %v994_v2, %v1001_v5 }
 0x2a1   : > { %v1003_v7 = vmul.f32 1.442695, %v1002_v6 }
 0x2a3   : > { %1767 = vpow2.f32 %v1003_v7 }
 0x2b0   : > { %v1768_v8 = vpop.eup %1767 }
 0x2b1   : > { %v1005_v9 = vsel %vm998_vm3, %v1768_v8, 0.0 }
 0x2b2   : > { %1006 = vadd.xlane.f32.xlu0 %v1005_v9 }
 0x33b   : > { %v1007_v13 = vpop.xlane.xlu0 %1006 }
 0x33c   : > { %1769 = vrcp.f32 %v1007_v13 }
 0x349   : > { %v1770_v14 = vpop.eup %1769 }
 0x34a   : > { %v1009_v15 = vmul.f32 %v1770_v14, %v1768_v8 }
 0x34c   : > { %1643 = vmatmul.mubr.msk.f32.vlgmr.msra.gmra.mxu1 %vm1010_vm4, %v1009_v15 }
 0x34d   : > { %1657 = vmatpush3.msra.mxu1 %v1087_v16  ;;  %1664 = vmatprep.mubr.msk.f32.mxu1 %vm1961_vm0, %v1960_v0 }
 0x34e   : > { %1658 = vmatprep.subr.mxu1 %v1960_v0 }
 0x34f   : > { %1659 = vmatpush3.msra.mxu1 %v1086_v17 }
 0x350   : > { %1660 = vmatprep.subr.mxu1 %v1960_v0 }
 0x351   : > { %1661 = vmatpush3.msra.mxu1 %v1085_v18 }
 0x352   : > { %1662 = vmatprep.subr.mxu1 %v1960_v0 }
 0x353   : > { %1663 = vmatpush3.msra.mxu1 %v1084_v19 }
 0x354   : > { %1665 = vmatmul.mubr.msk.f32.vlgmr.msra.gmra.mxu1 %vm447_vm1, %v919_v1 }
 0x40c   : > { %v1080_v21 = vpop.f32.mrf.mxu1 }
 0x40d   : > { %1654 = vmatmul.mubr.msk.f32.vlgmr.msra.gmra.mxu0 %vm447_vm1, %v1080_v21 }
 0x40e   : > { %v1644_v22 = vpop.f32.mrf.mxu1  ;;  %1675 = vmatprep.mubr.msk.f32.mxu0 %vm1961_vm0, %v1960_v0  ;;  %1668 = vmatpush3.msra.mxu0 %v1241_v25 }
 0x40f   : > { %1669 = vmatprep.subr.mxu0 %v1960_v0 }
 0x410   : > { %1670 = vmatpush3.msra.mxu0 %v1240_v26 }
 0x411   : > { %1671 = vmatprep.subr.mxu0 %v1960_v0 }
 0x412   : > { %1672 = vmatpush3.msra.mxu0 %v1239_v27 }
 0x413   : > { %1673 = vmatprep.subr.mxu0 %v1960_v0 }
 0x414   : > { %v1232_v23 = vpop.f32.mrf.mxu1  ;;  %1674 = vmatpush3.msra.mxu0 %v1238_v28 }
 0x416   : > { %v1666_v24 = vpop.f32.mrf.mxu1 }
 0x4cd   : > { %v1162_v30 = vpop.f32.mrf.mxu0 }
 0x4ce   : > { %v1233_v31 = vadd.f32 %v1232_v23, %v1162_v30 }
 0x4cf   : > { %v1655_v32 = vpop.f32.mrf.mxu0 }
 0x4d0   : > { %v1236_v33 = vadd.f32 %v1233_v31, %v615_v29 }
 0x4d2   : > { %1771 = vtanh.f32 %v1236_v33 }
 0x4df   : > { %v1772_v34 = vpop.eup %1771 }
 0x4e0   : > { %1676 = vmatmul.mubr.msk.f32.vlgmr.msra.gmra.mxu0 %vm447_vm1, %v1772_v34 }
 0x5a0   : > { %v1312_v0 = vpop.f32.mrf.mxu0 }
 0x5a1   : > { %v1313_v36 = vadd.f32 %v1312_v0, %v1242_v35 }
 0x5a2   : > { %v1677_v37 = vpop.f32.mrf.mxu0 }
 0x5a3   : > { %v1317_v38 = vsel %vm1316_vm5, %v1313_v36, -inf }
 0x5a4   : > { %1318 = vmax.xlane.f32.xlu1 %v1317_v38 }
 0x62d   : > { %v1319_v39 = vpop.xlane.xlu1 %1318 }
 0x62e   : > { %v1320_v40 = vsub.f32 %v1313_v36, %v1319_v39 }
 0x630   : > { %v1321_v41 = vmul.f32 1.442695, %v1320_v40 }
 0x632   : > { %1773 = vpow2.f32 %v1321_v41 }
 0x63f   : > { %v1774_v42 = vpop.eup %1773 }
 0x640   : > { %v1323_v43 = vsel %vm1316_vm5, %v1774_v42, 0.0 }
 0x641   : > { %1324 = vadd.xlane.f32.xlu1 %v1323_v43 }
 0x642   : > { %1868 = shalt.err (!%p1865_p0)
}
 0x643   : > { %s1869_s25 = scalar_lea.hbm %s1357_s28, 16  ;;  %s1873_s29 = scalar_lea.hbm %s2315_s10, 32 }
 0x644   : > { %p1870_p6 = scmp.ne.s32.totalorder %s1357_s28, %s1869_s25  ;;  %p1874_p1 = scmp.lt.s32.totalorder %s1357_s28, %s2315_s10 }
 0x645   : > { %p1875_p5 = scmp.lt.s32.totalorder %s1873_s29, %s1869_s25 }
 0x646   : > { %p1871_p9 = pnand %p1870_p6, %p2332_p3 }
 0x647   : > { %p1876_p10 = por %p1875_p5, %p1874_p1 }
 0x648   : > { %p1872_p13 = pneg %p1871_p9 }
 0x64a   : > { %p1877_p12 = pnand %p1876_p10, %p1872_p13 }
 0x64c   : > { %1880 = shalt.err (!%p1877_p12)
}
 0x64d   : > { %1691 = dma.vmem_to_hbm [thread:$0]  (%p2332_p3), %s1360_s30, 16, %s1357_s28, %s1334_s12  }
 0x64e   : > { %s419_s20 = scalar_lea.vmem [#allocation8], %s2200_s11  ;;  %s2333_s27 = sshll.u32 %s2040_s17, 4 }
 0x64f   : > { %s1346_s21 = sshll.u32 %s419_s20, 4  ;;  %s1344_s29 = scalar_lea.hbm %s2314_s9, %s2333_s27  ;;  %s1347_s21 = int_to_ptr.vmem [resolvable:$true] %s1346_s21 }
 0x650   : > { %s1330_s26 = scalar_lea.sflag [#allocation4], %s2200_s11  ;;  %s1881_s25 = scalar_lea.vmem %s1347_s21, 16 }
 0x651   : > { %p1882_p2 = scmp.ne.s32.totalorder %s1347_s21, %s1881_s25  ;;  %s1963_s28 = smov [#allocation8]  }
 0x652   : > { %s1885_s30 = sshll.u32 %s1963_s28, 4  ;;  %s1886_s30 = int_to_ptr.vmem [resolvable:$false] %s1885_s30 }
 0x653   : > { %p1883_p4 = pnand %p1882_p2, %p2332_p3  ;;  %s1887_s12 = scalar_lea.vmem %s1886_s30, 32 }
 0x654   : > { %p1888_p8 = scmp.lt.s32.totalorder %s1347_s21, %s1886_s30  ;;  %p1889_p11 = scmp.lt.s32.totalorder %s1887_s12, %s1881_s25 }
 0x655   : > { %p1884_p7 = pneg %p1883_p4 }
 0x656   : > { %p1890_p0 = por %p1889_p11, %p1888_p8 }
 0x658   : > { %p1891_p6 = pnand %p1890_p0, %p1884_p7 }
 0x6ca   : > { %v1325_v44 = vpop.xlane.xlu1 %1324 }
 0x6cb   : > { %1775 = vrcp.f32 %v1325_v44 }
 0x6d8   : > { %v1776_v45 = vpop.eup %1775 }
 0x6d9   : > { %v1327_v46 = vmul.f32 %v1776_v45, %v1774_v42 }
 0x6db   : > { %1328 = vst.msk [vmem:[%s419_s20] sm:$0x1] %vm1316_vm5, %v1327_v46 }
 0x6dc   : > { %1894 = shalt.err (!%p1891_p6)
}
 0x6dd   : > { %s1895_s17 = scalar_lea.hbm %s1344_s29, 16  ;;  %s1899_s22 = scalar_lea.hbm %s2314_s9, 32 }
 0x6de   : > { %p1896_p9 = scmp.ne.s32.totalorder %s1344_s29, %s1895_s17  ;;  %p1900_p5 = scmp.lt.s32.totalorder %s1344_s29, %s2314_s9 }
 0x6df   : > { %p1901_p10 = scmp.lt.s32.totalorder %s1899_s22, %s1895_s17 }
 0x6e0   : > { %p1897_p13 = pnand %p1896_p9, %p2332_p3 }
 0x6e1   : > { %p1902_p12 = por %p1901_p10, %p1900_p5 }
 0x6e2   : > { %p1898_p1 = pneg %p1897_p13 }
 0x6e4   : > { %p1903_p2 = pnand %p1902_p12, %p1898_p1 }
 0x6e6   : > { %1906 = shalt.err (!%p1903_p2)
}
 0x6e7   : > { %1690 = dma.vmem_to_hbm [thread:$0]  (%p2332_p3), %s1347_s21, 16, %s1344_s29, %s1330_s26  }
 0x6e8 PF: > { %p1717_p4 = scmp.ge.s32.totalorder %s1953_s16, 2  ;;  %s1371_s0 = sand.u32 1, %s1941_s13  }
 0x6e9   : > { %p2334_p7 = scmp.ne.s32.totalorder %s2323_s24, 0  ;;  %s1372_s1 = scalar_lea.sflag [#allocation4], %s1371_s0 }
 0x6eb   : > { %p1705_p8 = pnand %p1717_p4, %p2334_p7 }
 0x6ed   : > { %p1706_p11 = pneg %p1705_p8 }
 0x6ef   : > { %1932 = dma.done.wait (%p1706_p11), %s1372_s1, 16  }
 0x6f0   : > { %1934 = vsyncadd (%p1706_p11), %s1372_s1, 4294967280  ;;  %s1380_s25 = scalar_lea.sflag [#allocation10], %s1371_s0 }
 0x6f1   : > { %1936 = dma.done.wait (%p1706_p11), %s1380_s25, 16  }
 0x6f2   : > { %1938 = vsyncadd (%p1706_p11), %s1380_s25, 4294967280  ;;  %s2335_s23 = sld [smem:[#allocation15_spill]]  ;;  %p26_p3 = scmp.ge.s32.totalorder %s2044_s19, 4  }
 0x6f3   : > { %s2336_s13 = smov %s1945_s14  ;;  %s2337_s14 = smov %s1949_s15 }
 0x6f4   : > { %s2339_s16 = smov %s2044_s19  ;;  %28 = sbr.rel (!%p26_p3) target bundleno = 10 (0xa), region = 132 }
 0x6f8   : > { %s2338_s15 = smov %s2335_s23 }
 0x6f9   :  { %1384 = vsyncpa [#allocation3], 1 }
 0x6fa   :  { %1386 = vsyncpa [#allocation3 + $0x1], 1 }
 0x6fb   :  { %1387 = vsyncpa [#allocation6], 1 }
 0x6fc   :  { %1388 = vsyncpa [#allocation4], 1 }
 0x6fd   :  { %1390 = vsyncpa [#allocation4 + $0x1], 1 }
 0x6fe   :  { %1391 = vsyncpa [#allocation10], 1 }
 0x6ff   :  { %1393 = vsyncpa [#allocation10 + $0x1], 1 }

</bundles_post_ra>
